<compile_context>
chip_gen: v7x
topology: tpu7x:2x2x1
jax: 0.10.0
libtpu: 0.0.40
codegen_flags: <defaults>
</compile_context>

<pallas_src>
import math
from typing import List, NamedTuple

import numpy as np
import jax
import jax.numpy as jnp
from jax.experimental import pallas as pl
from jax.experimental.pallas import tpu as pltpu


class OneHot(NamedTuple):
    numbers: int
    dim: int


def _round_up(x: int, m: int) -> int:
    return ((x + m - 1) // m) * m


_CHUNK = 128  # packed rows per in-kernel sub-chunk


def _fused_embed_kernel(offsets_ref, idx_ref, table_ref, out_ref):
    """offsets_ref: (n_cols,) int32 SMEM (scalar prefetch) fused-vocab offset per idx column.
       idx_ref:     (tile_rows, n_cols) int32 raw indices (packed: n_cols = P * n_onehots).
       table_ref:   (fused_vocab, pack_width) block-diagonal table, VMEM-resident.
       out_ref:     (tile_rows, pack_width) packed / concatenated embeddings."""
    tile_rows, n_cols = idx_ref.shape
    fused_vocab = table_ref.shape[0]
    table = table_ref[...]

    def emit(r0, rows):
        idx = idx_ref[pl.ds(r0, rows), :]
        iota = jax.lax.broadcasted_iota(jnp.int32, (rows, fused_vocab), 1)
        # Vocab ranges are disjoint across columns after offsetting -> OR the compares.
        hot = iota == (idx[:, 0:1] + offsets_ref[0])
        for j in range(1, n_cols):
            hot = hot | (iota == (idx[:, j:j + 1] + offsets_ref[j]))
        out_ref[pl.ds(r0, rows), :] = jnp.dot(
            hot.astype(table.dtype), table,
            preferred_element_type=jnp.float32,
            precision=jax.lax.Precision.HIGHEST,   # exact f32 gather semantics
        ).astype(out_ref.dtype)

    if tile_rows <= _CHUNK:
        emit(0, tile_rows)
    else:
        # Wrapper guarantees tile_rows % _CHUNK == 0 when tile_rows > _CHUNK.
        def body(c, carry):
            emit(pl.multiple_of(c * _CHUNK, _CHUNK), _CHUNK)
            return carry
        jax.lax.fori_loop(0, tile_rows // _CHUNK, body, 0)


class OnehotEmbedding:
    """JAX/Pallas equivalent of the PyTorch OnehotEmbedding module's forward."""

    def __init__(self, tables: List[jax.Array]):
        assert all(t.ndim == 2 for t in tables)
        self.n_onehots = len(tables)
        self.dims = [int(t.shape[1]) for t in tables]
        self.vocabs = [int(t.shape[0]) for t in tables]
        self.output_dim = sum(self.dims)
        if self.output_dim == 0:
            return
        dtypes = {t.dtype for t in tables}
        assert len(dtypes) == 1, f"mixed table dtypes not supported: {dtypes}"
        self.dtype = tables[0].dtype
        itemsize = jnp.dtype(self.dtype).itemsize

        padded_vocab = _round_up(sum(self.vocabs), 8)   # clean sublane layout; pad rows never hit
        self.padded_vocab = padded_vocab

        # Row-packing factor: P logical rows per lane-dense (multiple-of-128) output row.
        p_cand = 128 // math.gcd(self.output_dim, 128)
        table_bytes = (p_cand * padded_vocab) * (p_cand * self.output_dim) * itemsize
        if p_cand * self.n_onehots <= 64 and table_bytes <= 8 * 1024 * 1024:
            self.P = p_cand
            self.pack_width = self.P * self.output_dim          # exact multiple of 128, zero waste
        else:
            self.P = 1                                          # fallback: pad columns to 128
            self.pack_width = _round_up(self.output_dim, 128)

        # Build the P-way replicated block-diagonal table + per-column vocab offsets ONCE
        # at init (numpy -> zero per-call XLA ops for table construction).
        np_tables = [np.asarray(jax.device_get(t)) for t in tables]
        big = np.zeros((self.P * padded_vocab, self.pack_width), dtype=self.dtype)
        offs = np.zeros((self.P * self.n_onehots,), dtype=np.int32)
        for p in range(self.P):
            row0, col0 = p * padded_vocab, p * self.output_dim
            r = c = 0
            for j, t in enumerate(np_tables):
                v, d = t.shape
                big[row0 + r: row0 + r + v, col0 + c: col0 + c + d] = t
                offs[p * self.n_onehots + j] = row0 + r
                r += v
                c += d
        self.table = jnp.asarray(big)
        self.offsets = jnp.asarray(offs)

    def __call__(self, onehots_idx: jax.Array) -> jax.Array:
        lead = onehots_idx.shape[:-1]
        assert onehots_idx.shape[-1] == self.n_onehots
        if self.output_dim == 0:
            return jnp.empty((*lead, 0), dtype=jnp.float32)

        P, pack_width = self.P, self.pack_width
        n_rows = int(np.prod(lead)) if lead else 1
        n_packed = -(-n_rows // P)

        # ---- tile sizing: ~2 MiB output slab per step, >=2 steps when enough work ----
        n_packed_8 = _round_up(max(n_packed, 1), 8)
        bytes_per_row = pack_width * jnp.dtype(self.dtype).itemsize
        tile = min(n_packed_8, 1024,
                   max(8, ((2 * 1024 * 1024 // bytes_per_row) // 8) * 8))
        if tile > _CHUNK:                              # kernel sub-chunking requirement
            tile = (tile // _CHUNK) * _CHUNK
        if tile >= n_packed_8 and n_packed_8 >= 16:
            half = _round_up((n_packed_8 + 1) // 2, 8)  # >=2 grid steps (v7x megacore)
            if half > _CHUNK:
                half = (half // _CHUNK) * _CHUNK
            tile = max(8, half)

        n_packed_pad = _round_up(n_packed, tile)
        n_rows_pad = n_packed_pad * P

        # Padded rows carry index 0 (they read table-0 row-0) but are sliced off below;
        # do NOT remove the [:n_rows] slice.
        flat_idx = onehots_idx.reshape(n_rows, self.n_onehots).astype(jnp.int32)
        if n_rows_pad != n_rows:
            flat_idx = jnp.pad(flat_idx, ((0, n_rows_pad - n_rows), (0, 0)))
        packed_idx = flat_idx.reshape(n_packed_pad, P * self.n_onehots)   # free reshape

        out_packed = pl.pallas_call(
            _fused_embed_kernel,
            out_shape=jax.ShapeDtypeStruct((n_packed_pad, pack_width), self.dtype),
            grid_spec=pltpu.PrefetchScalarGridSpec(
                num_scalar_prefetch=1,                 # offsets -> SMEM, added in-kernel
                grid=(n_packed_pad // tile,),
                in_specs=[
                    pl.BlockSpec((tile, P * self.n_onehots), lambda i, offs: (i, 0)),
                    pl.BlockSpec((P * self.padded_vocab, pack_width),
                                 lambda i, offs: (0, 0)),   # table stays VMEM-resident
                ],
                out_specs=pl.BlockSpec((tile, pack_width), lambda i, offs: (i, 0)),
            ),
            compiler_params=pltpu.CompilerParams(
                dimension_semantics=("parallel",),
            ),
        )(self.offsets, packed_idx, self.table)

        if P * self.output_dim == pack_width:
            # Packed layout is byte-identical to row-major (n_rows_pad, output_dim):
            # free reshape + cheap row slice (no padded-column writeback pass).
            out = out_packed.reshape(n_rows_pad, self.output_dim)[:n_rows]
        else:
            out = out_packed[:n_rows, :self.output_dim]
        return out.reshape(*lead, self.output_dim)


def make_tables(onehots: List[OneHot], key: jax.Array) -> List[jax.Array]:
    """nn.Embedding default init: weights ~ N(0, 1)."""
    tables = []
    for i, o in enumerate(onehots):
        k = jax.random.fold_in(key, i)
        tables.append(jax.random.normal(k, (o.numbers, o.dim), dtype=jnp.float32))
    return tables


if __name__ == "__main__":
    key = jax.random.PRNGKey(0)

    # Module config: three one-hot features, output_dim = 8 + 16 + 8 = 32 (-> P = 4).
    onehots_cfg = [OneHot(numbers=5, dim=8), OneHot(numbers=7, dim=16), OneHot(numbers=3, dim=8)]
    tables = make_tables(onehots_cfg, jax.random.fold_in(key, 100))
    embed = OnehotEmbedding(tables)

    # Input: (batch=2, seq=8, n_onehots=3) integer indices.
    batch, seq = 2, 8
    idx_cols = [
        jax.random.randint(jax.random.fold_in(key, 200 + i), (batch, seq), 0, o.numbers,
                           dtype=jnp.int32)
        for i, o in enumerate(onehots_cfg)
    ]
    onehots_idx = jnp.stack(idx_cols, axis=-1)  # (2, 8, 3)

    out = jax.block_until_ready(embed(onehots_idx))

    # Reference check (plain JAX gather) to validate semantics.
    ref = jnp.concatenate(
        [tables[i][onehots_idx[..., i]] for i in range(len(tables))], axis=-1
    )
    assert out.shape == (batch, seq, sum(o.dim for o in onehots_cfg)), out.shape
    assert jnp.allclose(out, ref, atol=1e-4, rtol=1e-4), "mismatch vs reference"

    print("KERNEL_OK")
</pallas_src>

<mosaic_0001>
module attributes {stable_mosaic.version = 11 : i64} {
  func.func @_fused_embed_kernel(%arg0: i32, %arg1: memref<12xi32, #tpu.memory_space<smem>>, %arg2: memref<8x12xi32, #tpu.memory_space<vmem>>, %arg3: memref<64x128xf32, #tpu.memory_space<vmem>>, %arg4: memref<8x128xf32, #tpu.memory_space<vmem>>) attributes {dimension_semantics = [#tpu.dimension_semantics<parallel>], iteration_bounds = array<i64: 1>, scalar_prefetch = 1 : i64, scratch_operands = 0 : i64, tpu.core_type = #tpu.core_type<tc>, window_params = [{transform_indices = @transform_0, window_bounds = array<i64: 8, 12>}, {pipeline_mode = #tpu.pipeline_mode<synchronous>, transform_indices = @transform_1, window_bounds = array<i64: 64, 128>}, {transform_indices = @transform_2, window_bounds = array<i64: 8, 128>}]} {
    %c0 = arith.constant 0 : index
    %c0_0 = arith.constant 0 : index
    %0 = vector.load %arg3[%c0, %c0_0] : memref<64x128xf32, #tpu.memory_space<vmem>>, vector<64x128xf32>
    %c0_1 = arith.constant 0 : index
    %c0_2 = arith.constant 0 : index
    %1 = vector.load %arg2[%c0_1, %c0_2] : memref<8x12xi32, #tpu.memory_space<vmem>>, vector<8x12xi32>
    %2 = tpu.iota {dimensions = array<i32: 1>} : vector<8x64xi32>
    %3 = vector.extract_strided_slice %1 {offsets = [0, 0], sizes = [8, 1], strides = [1, 1]} : vector<8x12xi32> to vector<8x1xi32>
    %c0_3 = arith.constant 0 : index
    %4 = memref.load %arg1[%c0_3] : memref<12xi32, #tpu.memory_space<smem>>
    %5 = vector.broadcast %4 : i32 to vector<8x1xi32>
    %6 = arith.addi %3, %5 : vector<8x1xi32>
    %7 = vector.broadcast %6 : vector<8x1xi32> to vector<8x64xi32>
    %8 = arith.cmpi eq, %2, %7 : vector<8x64xi32>
    %9 = vector.extract_strided_slice %1 {offsets = [0, 1], sizes = [8, 1], strides = [1, 1]} : vector<8x12xi32> to vector<8x1xi32>
    %c1 = arith.constant 1 : index
    %10 = memref.load %arg1[%c1] : memref<12xi32, #tpu.memory_space<smem>>
    %11 = vector.broadcast %10 : i32 to vector<8x1xi32>
    %12 = arith.addi %9, %11 : vector<8x1xi32>
    %13 = vector.broadcast %12 : vector<8x1xi32> to vector<8x64xi32>
    %14 = arith.cmpi eq, %2, %13 : vector<8x64xi32>
    %15 = arith.ori %8, %14 : vector<8x64xi1>
    %16 = vector.extract_strided_slice %1 {offsets = [0, 2], sizes = [8, 1], strides = [1, 1]} : vector<8x12xi32> to vector<8x1xi32>
    %c2 = arith.constant 2 : index
    %17 = memref.load %arg1[%c2] : memref<12xi32, #tpu.memory_space<smem>>
    %18 = vector.broadcast %17 : i32 to vector<8x1xi32>
    %19 = arith.addi %16, %18 : vector<8x1xi32>
    %20 = vector.broadcast %19 : vector<8x1xi32> to vector<8x64xi32>
    %21 = arith.cmpi eq, %2, %20 : vector<8x64xi32>
    %22 = arith.ori %15, %21 : vector<8x64xi1>
    %23 = vector.extract_strided_slice %1 {offsets = [0, 3], sizes = [8, 1], strides = [1, 1]} : vector<8x12xi32> to vector<8x1xi32>
    %c3 = arith.constant 3 : index
    %24 = memref.load %arg1[%c3] : memref<12xi32, #tpu.memory_space<smem>>
    %25 = vector.broadcast %24 : i32 to vector<8x1xi32>
    %26 = arith.addi %23, %25 : vector<8x1xi32>
    %27 = vector.broadcast %26 : vector<8x1xi32> to vector<8x64xi32>
    %28 = arith.cmpi eq, %2, %27 : vector<8x64xi32>
    %29 = arith.ori %22, %28 : vector<8x64xi1>
    %30 = vector.extract_strided_slice %1 {offsets = [0, 4], sizes = [8, 1], strides = [1, 1]} : vector<8x12xi32> to vector<8x1xi32>
    %c4 = arith.constant 4 : index
    %31 = memref.load %arg1[%c4] : memref<12xi32, #tpu.memory_space<smem>>
    %32 = vector.broadcast %31 : i32 to vector<8x1xi32>
    %33 = arith.addi %30, %32 : vector<8x1xi32>
    %34 = vector.broadcast %33 : vector<8x1xi32> to vector<8x64xi32>
    %35 = arith.cmpi eq, %2, %34 : vector<8x64xi32>
    %36 = arith.ori %29, %35 : vector<8x64xi1>
    %37 = vector.extract_strided_slice %1 {offsets = [0, 5], sizes = [8, 1], strides = [1, 1]} : vector<8x12xi32> to vector<8x1xi32>
    %c5 = arith.constant 5 : index
    %38 = memref.load %arg1[%c5] : memref<12xi32, #tpu.memory_space<smem>>
    %39 = vector.broadcast %38 : i32 to vector<8x1xi32>
    %40 = arith.addi %37, %39 : vector<8x1xi32>
    %41 = vector.broadcast %40 : vector<8x1xi32> to vector<8x64xi32>
    %42 = arith.cmpi eq, %2, %41 : vector<8x64xi32>
    %43 = arith.ori %36, %42 : vector<8x64xi1>
    %44 = vector.extract_strided_slice %1 {offsets = [0, 6], sizes = [8, 1], strides = [1, 1]} : vector<8x12xi32> to vector<8x1xi32>
    %c6 = arith.constant 6 : index
    %45 = memref.load %arg1[%c6] : memref<12xi32, #tpu.memory_space<smem>>
    %46 = vector.broadcast %45 : i32 to vector<8x1xi32>
    %47 = arith.addi %44, %46 : vector<8x1xi32>
    %48 = vector.broadcast %47 : vector<8x1xi32> to vector<8x64xi32>
    %49 = arith.cmpi eq, %2, %48 : vector<8x64xi32>
    %50 = arith.ori %43, %49 : vector<8x64xi1>
    %51 = vector.extract_strided_slice %1 {offsets = [0, 7], sizes = [8, 1], strides = [1, 1]} : vector<8x12xi32> to vector<8x1xi32>
    %c7 = arith.constant 7 : index
    %52 = memref.load %arg1[%c7] : memref<12xi32, #tpu.memory_space<smem>>
    %53 = vector.broadcast %52 : i32 to vector<8x1xi32>
    %54 = arith.addi %51, %53 : vector<8x1xi32>
    %55 = vector.broadcast %54 : vector<8x1xi32> to vector<8x64xi32>
    %56 = arith.cmpi eq, %2, %55 : vector<8x64xi32>
    %57 = arith.ori %50, %56 : vector<8x64xi1>
    %58 = vector.extract_strided_slice %1 {offsets = [0, 8], sizes = [8, 1], strides = [1, 1]} : vector<8x12xi32> to vector<8x1xi32>
    %c8 = arith.constant 8 : index
    %59 = memref.load %arg1[%c8] : memref<12xi32, #tpu.memory_space<smem>>
    %60 = vector.broadcast %59 : i32 to vector<8x1xi32>
    %61 = arith.addi %58, %60 : vector<8x1xi32>
    %62 = vector.broadcast %61 : vector<8x1xi32> to vector<8x64xi32>
    %63 = arith.cmpi eq, %2, %62 : vector<8x64xi32>
    %64 = arith.ori %57, %63 : vector<8x64xi1>
    %65 = vector.extract_strided_slice %1 {offsets = [0, 9], sizes = [8, 1], strides = [1, 1]} : vector<8x12xi32> to vector<8x1xi32>
    %c9 = arith.constant 9 : index
    %66 = memref.load %arg1[%c9] : memref<12xi32, #tpu.memory_space<smem>>
    %67 = vector.broadcast %66 : i32 to vector<8x1xi32>
    %68 = arith.addi %65, %67 : vector<8x1xi32>
    %69 = vector.broadcast %68 : vector<8x1xi32> to vector<8x64xi32>
    %70 = arith.cmpi eq, %2, %69 : vector<8x64xi32>
    %71 = arith.ori %64, %70 : vector<8x64xi1>
    %72 = vector.extract_strided_slice %1 {offsets = [0, 10], sizes = [8, 1], strides = [1, 1]} : vector<8x12xi32> to vector<8x1xi32>
    %c10 = arith.constant 10 : index
    %73 = memref.load %arg1[%c10] : memref<12xi32, #tpu.memory_space<smem>>
    %74 = vector.broadcast %73 : i32 to vector<8x1xi32>
    %75 = arith.addi %72, %74 : vector<8x1xi32>
    %76 = vector.broadcast %75 : vector<8x1xi32> to vector<8x64xi32>
    %77 = arith.cmpi eq, %2, %76 : vector<8x64xi32>
    %78 = arith.ori %71, %77 : vector<8x64xi1>
    %79 = vector.extract_strided_slice %1 {offsets = [0, 11], sizes = [8, 1], strides = [1, 1]} : vector<8x12xi32> to vector<8x1xi32>
    %c11 = arith.constant 11 : index
    %80 = memref.load %arg1[%c11] : memref<12xi32, #tpu.memory_space<smem>>
    %81 = vector.broadcast %80 : i32 to vector<8x1xi32>
    %82 = arith.addi %79, %81 : vector<8x1xi32>
    %83 = vector.broadcast %82 : vector<8x1xi32> to vector<8x64xi32>
    %84 = arith.cmpi eq, %2, %83 : vector<8x64xi32>
    %85 = arith.ori %78, %84 : vector<8x64xi1>
    %86 = arith.extui %85 : vector<8x64xi1> to vector<8x64xi32>
    %87 = arith.sitofp %86 : vector<8x64xi32> to vector<8x64xf32>
    %cst = arith.constant dense<0.000000e+00> : vector<8x128xf32>
    %88 = tpu.matmul %87, %0, %cst {dimension_numbers = #tpu.dot_dimension_numbers<[1], [0], [0], [1], [0, 0, 1, 1], [], []>, precision = #tpu.contract_precision<fp32>} : vector<8x64xf32>, vector<64x128xf32>, vector<8x128xf32> -> vector<8x128xf32>
    %c0_4 = arith.constant 0 : index
    %c0_5 = arith.constant 0 : index
    %89 = vector.load %arg4[%c0_4, %c0_5] : memref<8x128xf32, #tpu.memory_space<vmem>>, vector<8x128xf32>
    tpu.vector_store %arg4[%c0_4, %c0_5], %88 {strides = array<i32>} : memref<8x128xf32, #tpu.memory_space<vmem>>, vector<8x128xf32>,
    return
  }
  func.func @transform_0(%arg0: i32, %arg1: memref<12xi32, #tpu.memory_space<smem>>) -> (i32, i32) {
    %c0_i32 = arith.constant 0 : i32
    %c0_i32_0 = arith.constant 0 : i32
    return %arg0, %c0_i32 : i32, i32
  }
  func.func @transform_1(%arg0: i32, %arg1: memref<12xi32, #tpu.memory_space<smem>>) -> (i32, i32) {
    %c0_i32 = arith.constant 0 : i32
    %c0_i32_0 = arith.constant 0 : i32
    %c0_i32_1 = arith.constant 0 : i32
    return %c0_i32, %c0_i32_0 : i32, i32
  }
  func.func @transform_2(%arg0: i32, %arg1: memref<12xi32, #tpu.memory_space<smem>>) -> (i32, i32) {
    %c0_i32 = arith.constant 0 : i32
    %c0_i32_0 = arith.constant 0 : i32
    return %arg0, %c0_i32 : i32, i32
  }
}

</mosaic_0001>

<bundles_post_ra>
// kernel: tpu_custom_call.1
= control target key start
LH: loop header
LB: loop body
LE: loop exit
PB: predicated region body
PF: predicated region fallthrough
CT: control target
= control target key end

     0   :  { %s1340_s0 = inlined_call_operand.hbm [shape: s32[12], index: 0, kind: input, shape index: {}]   ;;  %s1341_s1 = inlined_call_operand.hbm [shape: s32[8,12], index: 1, kind: input, shape index: {}]   ;;  %s1342_s2 = inlined_call_operand.hbm [shape: f32[64,128], index: 2, kind: input, shape index: {}]   ;;  %s1343_s3 = inlined_call_operand.hbm [shape: f32[8,128], index: 3, kind: output, shape index: {}]  }
   0x1   :  { %s1006_s14 = scalar_lea.hbm %s1340_s0, 16 }
   0x2   :  { %p1007_p0 = scmp.ne.s32.totalorder %s1340_s0, %s1006_s14  ;;  %p1010_p1 = scmp.lt.u32.totalorder %s1006_s14, %s1340_s0 }
   0x4   :  { %p1012_p2 = pnand %p1010_p1, %p1007_p0 }
   0x6   :  { %1015 = shalt.err (!%p1012_p2)  }
   0x7   :  { %s1090_s19 = smov [#allocation3]  }
   0x8   :  { %9 = dma.hbm_to_smem %s1340_s0, 16, %s1090_s19, [#allocation2] }
   0x9   :  { %1082 = dma.done.wait [#allocation2], 16 }
   0xa   :  { %1083 = vsyncadd [#allocation2], 4294967280 }
   0xb   :  { %11 = sfence }
   0xc   :  { %12 = vsyncpa [#allocation5], 0 }
   0xd   :  { %13 = vsyncpa [#allocation8], 0 }
   0xe   :  { %14 = vsyncpa [#allocation6], 0  ;;  %s1091_s22 = smov [#allocation4]   ;;  %s1092_s24 = smov [#allocation7]  }
   0xf   :  { %s21_s23 = sshll.u32 %s1091_s22, 4  ;;  %s30_s25 = sshll.u32 %s1092_s24, 4  ;;  %s22_s23 = int_to_ptr.vmem [resolvable:$true] %s21_s23  ;;  %s1143_s25 = int_to_ptr.vmem [resolvable:$true] %s30_s25 }
  0x10   :  { %s1016_s28 = scalar_lea.hbm %s1341_s1, 128 }
  0x11   :  { %p1017_p3 = scmp.ne.s32.totalorder %s1341_s1, %s1016_s28  ;;  %p1020_p4 = scmp.lt.u32.totalorder %s1016_s28, %s1341_s1 }
  0x13   :  { %p1022_p5 = pnand %p1020_p4, %p1017_p3 }
  0x15   :  { %1025 = shalt.err (!%p1022_p5)
}
  0x16   :  { %s1026_s5 = scalar_lea.vmem %s22_s23, 128  ;;  %p1031_p7 = scmp.lt.s32.totalorder %s22_s23, %s22_s23 }
  0x17   :  { %p1027_p6 = scmp.ne.s32.totalorder %s22_s23, %s1026_s5  ;;  %p1032_p8 = scmp.lt.s32.totalorder %s1026_s5, %s1026_s5 }
  0x19   :  { %p1033_p9 = por %p1032_p8, %p1031_p7 }
  0x1b   :  { %p1034_p10 = pnand %p1033_p9, %p1027_p6 }
  0x1d   :  { %1037 = shalt.err (!%p1034_p10)
}
  0x1e   :  { %24 = dma.hbm_to_vmem [thread:$0]  %s1341_s1, 128, %s22_s23, [#allocation5]  }
  0x1f   :  { %s1038_s10 = scalar_lea.hbm %s1342_s2, 1024 }
  0x20   :  { %p1039_p11 = scmp.ne.s32.totalorder %s1342_s2, %s1038_s10  ;;  %p1042_p12 = scmp.lt.u32.totalorder %s1038_s10, %s1342_s2 }
  0x22   :  { %p1044_p13 = pnand %p1042_p12, %p1039_p11 }
  0x24   :  { %1047 = shalt.err (!%p1044_p13)
}
  0x25   :  { %s1048_s15 = scalar_lea.vmem %s1143_s25, 1024  ;;  %p1053_p1 = scmp.lt.s32.totalorder %s1143_s25, %s1143_s25 }
  0x26   :  { %p1049_p0 = scmp.ne.s32.totalorder %s1143_s25, %s1048_s15  ;;  %p1054_p2 = scmp.lt.s32.totalorder %s1048_s15, %s1048_s15 }
  0x28   :  { %p1055_p3 = por %p1054_p2, %p1053_p1 }
  0x2a   :  { %p1056_p4 = pnand %p1055_p3, %p1049_p0 }
  0x2c   :  { %1059 = shalt.err (!%p1056_p4)
}
  0x2d   :  { %s1093_s1 = smov 128   ;;  %s1094_s16 = smov 8  }
  0x2e   :  { %36 = dma.hbm_to_vmem [thread:$0]  %s1342_s2, 1024, %s1143_s25, [#allocation8], %s1093_s1, %s1093_s1, %s1094_s16  }
  0x2f   :  { %1084 = dma.done.wait [#allocation5], 128  }
  0x30   :  { %1085 = vsyncadd [#allocation5], 4294967168 }
  0x31   :  { %1086 = dma.done.wait [#allocation8], 1024  }
  0x32   :  { %1087 = vsyncadd [#allocation8], 4294966272  ;;  %v1095_v0 = vmov 2   ;;  %v1096_v1 = vmov 0   ;;  %s710_s19 = sld [smem:[#allocation3 + $0x2]]  ;;  %s54_s20 = sld [smem:[#allocation3]] }
  0x33   :  { %996 = vset.pattern.permute.xlu1 %v1095_v0  ;;  %994 = vset.pattern.permute.xlu0 %v1096_v1  ;;  %s711_s21 = sld [smem:[#allocation3 + $0x3]]  ;;  %s709_s22 = sld [smem:[#allocation3 + $0x1]]  ;;  %v1174_v2 = vld [vmem:[#allocation4] sm:$0xff]  ;;  %v1097_v13 = vmov 3   ;;  %v1098_v14 = vmov 1   ;;  %v1099_v19 = vmov 4  }
  0x34   :  { %s712_s23 = sld [smem:[#allocation3 + $0x4]]  ;;  %s713_s24 = sld [smem:[#allocation3 + $0x5]]  ;;  %v1100_v20 = vmov 5   ;;  %v1101_v25 = vmov 6   ;;  %v1102_v26 = vmov 8   ;;  %v43_v30 = vld [vmem:[#allocation7] sm:$0xff] }
  0x35   :  { %s714_s2 = sld [smem:[#allocation3 + $0x6]]  ;;  %s716_s25 = sld [smem:[#allocation3 + $0x8]]  ;;  %v44_v31 = vld [vmem:[#allocation7 + $0x8] sm:$0xff]  ;;  %v1103_v32 = vmov 7   ;;  %v1104_v33 = vmov 11   ;;  %v156_v34 = vand.u32 4294901760, %v43_v30 }
  0x36   :  { %s715_s26 = sld [smem:[#allocation3 + $0x7]]  ;;  %s719_s27 = sld [smem:[#allocation3 + $0xb]]  ;;  %v159_v35 = vand.u32 4294901760, %v44_v31  ;;  %v1105_v38 = vmov 0.0|0.0   ;;  %v45_v41 = vld [vmem:[#allocation7 + $0x10] sm:$0xff]  ;;  %v46_v42 = vld [vmem:[#allocation7 + $0x18] sm:$0xff] }
  0x37   :  { %s717_s28 = sld [smem:[#allocation3 + $0x9]]  ;;  %s1184_s29 = sld [smem:[#allocation3 + $0xa]]  ;;  %928 = vmatprep.subr.bf16.mxu0 %v1105_v38  ;;  %v1192_v39 = vsub.f32 %v43_v30, %v156_v34  ;;  %892 = vmatprep.subr.bf16.mxu1 %v1105_v38  ;;  %v162_v44 = vand.u32 4294901760, %v45_v41  ;;  %v165_v45 = vand.u32 4294901760, %v46_v42  ;;  %v1106_v46 = vmov 9   ;;  %v47_v51 = vld [vmem:[#allocation7 + $0x20] sm:$0xff] }
  0x38   :  { %v70_v3 = vstv %s710_s19  ;;  %v55_v4 = vstv %s54_s20  ;;  %v1189_v37 = vpack.c.bf16 %v159_v35, %v156_v34  ;;  %v1194_v40 = vsub.f32 %v44_v31, %v159_v35  ;;  %v48_v52 = vld [vmem:[#allocation7 + $0x28] sm:$0xff]  ;;  %v49_v57 = vld [vmem:[#allocation7 + $0x30] sm:$0xff]  ;;  %v50_v58 = vld [vmem:[#allocation7 + $0x38] sm:$0xff]  ;;  %s1110_s30 = smov [#allocation9]  }
  0x39   :  { %v71_v5 = vadd.s32 %v70_v3, %v1174_v2  ;;  %v56_v6 = vadd.s32 %v55_v4, %v1174_v2  ;;  %v78_v7 = vstv %s711_s21  ;;  %v62_v8 = vstv %s709_s22  ;;  %s699_s0 = sshll.u32 %s1110_s30, 4  ;;  %s700_s0 = int_to_ptr.vmem [resolvable:$true] %s699_s0 }
  0x3a   :  { %v79_v9 = vadd.s32 %v78_v7, %v1174_v2  ;;  %v63_v10 = vadd.s32 %v62_v8, %v1174_v2  ;;  %v86_v11 = vstv %s712_s23  ;;  %v94_v12 = vstv %s713_s24  ;;  %930 = vmatpush3.bf16.msra.mxu0 %v1189_v37  ;;  %894 = vmatpush3.bf16.msra.mxu1 %v1189_v37  ;;  %s1060_s4 = scalar_lea.vmem %s700_s0, 128  ;;  %p1065_p6 = scmp.lt.s32.totalorder %s700_s0, %s700_s0 }
  0x3b   :  { %73 = vperm.xlu1 %996, %v71_v5   ;;  %58 = vperm.xlu0 %994, %v56_v6   ;;  %v87_v15 = vadd.s32 %v86_v11, %v1174_v2  ;;  %v95_v16 = vadd.s32 %v94_v12, %v1174_v2  ;;  %v102_v17 = vstv %s714_s2  ;;  %v118_v18 = vstv %s716_s25  ;;  %p1061_p5 = scmp.ne.s32.totalorder %s700_s0, %s1060_s4  ;;  %p1066_p7 = scmp.lt.s32.totalorder %s1060_s4, %s1060_s4 }
  0x3c   :  { %v103_v21 = vadd.s32 %v102_v17, %v1174_v2  ;;  %v119_v22 = vadd.s32 %v118_v18, %v1174_v2  ;;  %v110_v23 = vstv %s715_s26  ;;  %v142_v24 = vstv %s719_s27  ;;  %931 = vmatprep.subr.bf16.mxu0 %v1105_v38  ;;  %895 = vmatprep.subr.bf16.mxu1 %v1105_v38 }
  0x3d   :  { %v111_v27 = vadd.s32 %v110_v23, %v1174_v2  ;;  %v143_v28 = vadd.s32 %v142_v24, %v1174_v2  ;;  %v126_v29 = vstv %s717_s28  ;;  %v134_v43 = vstv %s1184_s29  ;;  %p1067_p8 = por %p1066_p7, %p1065_p6 }
  0x3e   :  { %v127_v36 = vadd.s32 %v126_v29, %v1174_v2  ;;  %v1201_v47 = vpack.c.bf16 %v165_v45, %v162_v44  ;;  %v135_v48 = vadd.s32 %v134_v43, %v1174_v2  ;;  %v1205_v49 = vsub.f32 %v45_v41, %v162_v44 }
  0x3f   :  { %997 = vset.pattern.permute.xlu1 %v1097_v13  ;;  %995 = vset.pattern.permute.xlu0 %v1098_v14  ;;  %v1207_v50 = vsub.f32 %v46_v42, %v165_v45  ;;  %v168_v53 = vand.u32 4294901760, %v47_v51  ;;  %v171_v54 = vand.u32 4294901760, %v48_v52  ;;  %v1107_v55 = vmov 10   ;;  %p1068_p9 = pnand %p1067_p8, %p1061_p5 }
  0x40   :  { %81 = vperm.xlu1 %997, %v79_v9   ;;  %65 = vperm.xlu0 %995, %v63_v10   ;;  %v174_v59 = vand.u32 4294901760, %v49_v57  ;;  %v177_v60 = vand.u32 4294901760, %v50_v58  ;;  %v241_v2 = vand.u32 4294901760, %v1192_v39  ;;  %v248_v3 = vand.u32 4294901760, %v1194_v40 }
  0x41   :  { %933 = vmatpush3.bf16.msra.mxu0 %v1201_v47  ;;  %897 = vmatpush3.bf16.msra.mxu1 %v1201_v47  ;;  %v1213_v56 = vpack.c.bf16 %v171_v54, %v168_v53  ;;  %v1221_v62 = vsub.f32 %v47_v51, %v168_v53  ;;  %v1223_v63 = vsub.f32 %v48_v52, %v171_v54  ;;  %vm1344_vm0 = vmmov 0  }
  0x42   :  { %934 = vmatprep.subr.bf16.mxu0 %v1105_v38  ;;  %898 = vmatprep.subr.bf16.mxu1 %v1105_v38  ;;  %v1219_v61 = vpack.c.bf16 %v177_v60, %v174_v59  ;;  %v1225_v0 = vsub.f32 %v49_v57, %v174_v59  ;;  %v1227_v1 = vsub.f32 %v50_v58, %v177_v60  ;;  %v1109_v4 = vmov 0.0  }
  0x43   :  { %851 = vmatprep.mubr.msk.f32.mxu0 %vm1344_vm0, %v1109_v4  ;;  %794 = vmatprep.mubr.msk.f32.mxu1 %vm1344_vm0, %v1109_v4  ;;  %v1238_v5 = vpack.c.bf16 %v248_v3, %v241_v2  ;;  %v242_v6 = vsub.f32 %v1192_v39, %v241_v2  ;;  %v249_v7 = vsub.f32 %v1194_v40, %v248_v3  ;;  %v255_v10 = vand.u32 4294901760, %v1205_v49 }
  0x44   :  { %998 = vset.pattern.permute.xlu1 %v1099_v19  ;;  %999 = vset.pattern.permute.xlu0 %v1100_v20  ;;  %v262_v11 = vand.u32 4294901760, %v1207_v50  ;;  %v269_v18 = vand.u32 4294901760, %v1221_v62  ;;  %v276_v19 = vand.u32 4294901760, %v1223_v63  ;;  %v917_v35 = vpack.c.bf16 %v1194_v40, %v1192_v39 }
  0x45   :  { %89 = vperm.xlu1 %998, %v87_v15   ;;  %97 = vperm.xlu0 %999, %v95_v16   ;;  %v243_v8 = vand.u32 4294901760, %v242_v6  ;;  %v250_v9 = vand.u32 4294901760, %v249_v7  ;;  %v256_v14 = vsub.f32 %v1205_v49, %v255_v10  ;;  %v923_v41 = vpack.c.bf16 %v1223_v63, %v1221_v62 }
  0x46   :  { %936 = vmatpush3.bf16.msra.mxu0 %v1213_v56  ;;  %900 = vmatpush3.bf16.msra.mxu1 %v1213_v56  ;;  %v1247_v13 = vpack.c.bf16 %v262_v11, %v255_v10  ;;  %v263_v15 = vsub.f32 %v1207_v50, %v262_v11  ;;  %v277_v23 = vsub.f32 %v1223_v63, %v276_v19 }
  0x47   :  { %937 = vmatprep.subr.bf16.mxu0 %v1105_v38  ;;  %901 = vmatprep.subr.bf16.mxu1 %v1105_v38  ;;  %v1245_v12 = vpack.c.bf16 %v250_v9, %v243_v8  ;;  %v257_v16 = vand.u32 4294901760, %v256_v14  ;;  %v926_v42 = vpack.c.bf16 %v1227_v1, %v1225_v0 }
  0x48   :  { %v264_v17 = vand.u32 4294901760, %v263_v15 }
  0x49   :  { %1000 = vset.pattern.permute.xlu1 %v1101_v25  ;;  %1002 = vset.pattern.permute.xlu0 %v1102_v26  ;;  %v278_v25 = vand.u32 4294901760, %v277_v23  ;;  %v283_v26 = vand.u32 4294901760, %v1225_v0 }
  0x4a   :  { %105 = vperm.xlu1 %1000, %v103_v21   ;;  %121 = vperm.xlu0 %1002, %v119_v22   ;;  %v1253_v20 = vpack.c.bf16 %v264_v17, %v257_v16  ;;  %v1255_v21 = vpack.c.bf16 %v276_v19, %v269_v18  ;;  %v270_v22 = vsub.f32 %v1221_v62, %v269_v18 }
  0x4b   :  { %939 = vmatpush3.bf16.msra.mxu0 %v1219_v61  ;;  %903 = vmatpush3.bf16.msra.mxu1 %v1219_v61  ;;  %v284_v30 = vsub.f32 %v1225_v0, %v283_v26 }
  0x4c   :  { %940 = vmatprep.subr.bf16.mxu0 %v1105_v38  ;;  %904 = vmatprep.subr.bf16.mxu1 %v1105_v38  ;;  %v271_v24 = vand.u32 4294901760, %v270_v22 }
  0x4e   :  { %1001 = vset.pattern.permute.xlu1 %v1103_v32  ;;  %1005 = vset.pattern.permute.xlu0 %v1104_v33  ;;  %v285_v32 = vand.u32 4294901760, %v284_v30 }
  0x4f   :  { %113 = vperm.xlu1 %1001, %v111_v27   ;;  %145 = vperm.xlu0 %1005, %v143_v28   ;;  %v290_v27 = vand.u32 4294901760, %v1227_v1  ;;  %v1261_v28 = vpack.c.bf16 %v278_v25, %v271_v24 }
  0x51   :  { %v1263_v29 = vpack.c.bf16 %v290_v27, %v283_v26  ;;  %v291_v31 = vsub.f32 %v1227_v1, %v290_v27 }
  0x53   :  { %1003 = vset.pattern.permute.xlu1 %v1106_v46  ;;  %v292_v33 = vand.u32 4294901760, %v291_v31  ;;  %v52_v46 = vlaneseq }
  0x54   :  { %129 = vperm.xlu1 %1003, %v127_v36   ;;  %v920_v36 = vpack.c.bf16 %v1207_v50, %v1205_v49 }
  0x55   :  { %v1267_v34 = vpack.c.bf16 %v292_v33, %v285_v32  ;;  %v53_v51 = vand.u32 127, %v52_v46 }
  0x58   :  { %1004 = vset.pattern.permute.xlu1 %v1107_v55 }
  0x59   :  { %137 = vperm.xlu1 %1004, %v135_v48  }
  0xba   :  { %v74_v43 = vpop.permute.xlu1 %73  ;;  %v59_v44 = vpop.permute.xlu0 %58 }
  0xbb   :  { %vm60_vm1 = vcmp.eq.s32.totalorder %v53_v51, %v59_v44  ;;  %vm75_vm4 = vcmp.eq.s32.totalorder %v53_v51, %v74_v43 }
  0xbf   :  { %v82_v45 = vpop.permute.xlu1 %81  ;;  %v66_v48 = vpop.permute.xlu0 %65 }
  0xc0   :  { %vm67_vm2 = vcmp.eq.s32.totalorder %v53_v51, %v66_v48  ;;  %vm83_vm7 = vcmp.eq.s32.totalorder %v53_v51, %v82_v45 }
  0xc1   :  { %vm68_vm3 = vmor %vm60_vm1, %vm67_vm2 }
  0xc2   :  { %vm76_vm5 = vmor %vm68_vm3, %vm75_vm4 }
  0xc3   :  { %vm84_vm8 = vmor %vm76_vm5, %vm83_vm7 }
  0xc4   :  { %v90_v52 = vpop.permute.xlu1 %89  ;;  %v98_v54 = vpop.permute.xlu0 %97 }
  0xc5   :  { %vm91_vm6 = vcmp.eq.s32.totalorder %v53_v51, %v90_v52  ;;  %vm99_vm10 = vcmp.eq.s32.totalorder %v53_v51, %v98_v54 }
  0xc6   :  { %vm92_vm9 = vmor %vm84_vm8, %vm91_vm6  ;;  %vm151_vm6 = vcmask 523264  }
  0xc7   :  { %vm100_vm13 = vmor %vm92_vm9, %vm99_vm10  ;;  %vm1346_vm9 = vmmov 0  }
  0xc9   :  { %v106_v53 = vpop.permute.xlu1 %105  ;;  %v122_v57 = vpop.permute.xlu0 %121 }
  0xca   :  { %vm107_vm11 = vcmp.eq.s32.totalorder %v53_v51, %v106_v53  ;;  %vm123_vm0 = vcmp.eq.s32.totalorder %v53_v51, %v122_v57 }
  0xcb   :  { %vm108_vm14 = vmor %vm100_vm13, %vm107_vm11 }
  0xce   :  { %v114_v55 = vpop.permute.xlu1 %113  ;;  %v146_v59 = vpop.permute.xlu0 %145 }
  0xcf   :  { %vm115_vm12 = vcmp.eq.s32.totalorder %v53_v51, %v114_v55  ;;  %vm147_vm3 = vcmp.eq.s32.totalorder %v53_v51, %v146_v59 }
  0xd0   :  { %vm116_vm15 = vmor %vm108_vm14, %vm115_vm12 }
  0xd1   :  { %vm124_vm2 = vmor %vm116_vm15, %vm123_vm0 }
  0xd3   :  { %v130_v58 = vpop.permute.xlu1 %129 }
  0xd4   :  { %vm131_vm1 = vcmp.eq.s32.totalorder %v53_v51, %v130_v58 }
  0xd5   :  { %vm132_vm4 = vmor %vm124_vm2, %vm131_vm1 }
  0xd8   :  { %v138_v60 = vpop.permute.xlu1 %137 }
  0xd9   :  { %vm139_vm5 = vcmp.eq.s32.totalorder %v53_v51, %v138_v60 }
  0xda   :  { %vm140_vm7 = vmor %vm132_vm4, %vm139_vm5 }
  0xdb   :  { %vm148_vm8 = vmor %vm140_vm7, %vm147_vm3 }
  0xdc   :  { %v720_v2 = vsel %vm148_vm8, 1.0, %v1109_v4 }
  0xdd   :  { %v153_v3 = vsel %vm151_vm6, %v720_v2, 0 }
  0xde   :  { %v229_v6 = vsub.f32 %v153_v3, %v153_v3 }
  0xe0   :  { %v230_v7 = vand.u32 4294901760, %v229_v6 }
  0xe2   :  { %852 = vmatmul.mubr.f32.vlgmr.msra.gmra.mrb[0].mxu0 %v230_v7  ;;  %v231_v8 = vsub.f32 %v229_v6, %v230_v7 }
  0xe3   :  { %942 = vmatpush3.bf16.msra.mxu0 %v1238_v5  ;;  %870 = vmatprep.mubr.msk.f32.mxu0 %vm1346_vm9, %v1109_v4 }
  0xe4   :  { %943 = vmatprep.subr.bf16.mxu0 %v1105_v38  ;;  %v232_v9 = vand.u32 4294901760, %v231_v8 }
  0xe6   :  { %795 = vmatmul.mubr.f32.vlgmr.msra.gmra.mrb[0].mxu1 %v232_v9 }
  0xe7   :  { %906 = vmatpush3.bf16.msra.mxu1 %v1245_v12  ;;  %945 = vmatpush3.bf16.msra.mxu0 %v1247_v13 }
  0xe8   :  { %907 = vmatprep.subr.bf16.mxu1 %v1105_v38  ;;  %946 = vmatprep.subr.bf16.mxu0 %v1105_v38 }
  0xe9   :  { %813 = vmatprep.mubr.msk.f32.mxu1 %vm1346_vm9, %v1109_v4 }
  0xeb   :  { %909 = vmatpush3.bf16.msra.mxu1 %v1253_v20  ;;  %948 = vmatpush3.bf16.msra.mxu0 %v1255_v21 }
  0xec   :  { %910 = vmatprep.subr.bf16.mxu1 %v1105_v38  ;;  %949 = vmatprep.subr.bf16.mxu0 %v1105_v38 }
  0xef   :  { %912 = vmatpush3.bf16.msra.mxu1 %v1261_v28  ;;  %951 = vmatpush3.bf16.msra.mxu0 %v1263_v29 }
  0xf0   :  { %913 = vmatprep.subr.bf16.mxu1 %v1105_v38  ;;  %952 = vmatprep.subr.bf16.mxu0 %v1105_v38 }
  0xf2   :  { %871 = vmatmul.mubr.msk.f32.vlgmr.msra.gmra.mrb[0].mxu0 %vm151_vm6, %v720_v2 }
  0xf3   :  { %915 = vmatpush3.bf16.msra.mxu1 %v1267_v34  ;;  %954 = vmatpush3.bf16.msra.mxu0 %v1189_v37 }
  0xf4   :  { %916 = vmatprep.subr.bf16.mxu1 %v1105_v38  ;;  %955 = vmatprep.subr.bf16.mxu0 %v1105_v38 }
  0xf5   :  { %889 = vmatprep.mubr.msk.f32.mxu0 %vm1346_vm9, %v1109_v4 }
  0xf6   :  { %814 = vmatmul.mubr.msk.f32.vlgmr.msra.gmra.mrb[0].mxu1 %vm151_vm6, %v720_v2 }
  0xf7   :  { %918 = vmatpush3.bf16.msra.mxu1 %v917_v35  ;;  %957 = vmatpush3.bf16.msra.mxu0 %v1201_v47 }
  0xf8   :  { %919 = vmatprep.subr.bf16.mxu1 %v1105_v38  ;;  %958 = vmatprep.subr.bf16.mxu0 %v1105_v38 }
  0xf9   :  { %832 = vmatprep.mubr.msk.f32.mxu1 %vm1346_vm9, %v1109_v4 }
  0xfb   :  { %921 = vmatpush3.bf16.msra.mxu1 %v920_v36  ;;  %960 = vmatpush3.bf16.msra.mxu0 %v1213_v56 }
  0xfc   :  { %922 = vmatprep.subr.bf16.mxu1 %v1105_v38  ;;  %961 = vmatprep.subr.bf16.mxu0 %v1105_v38 }
  0xff   :  { %924 = vmatpush3.bf16.msra.mxu1 %v923_v41  ;;  %963 = vmatpush3.bf16.msra.mxu0 %v1219_v61 }
 0x100   :  { %925 = vmatprep.subr.bf16.mxu1 %v1105_v38 }
 0x102   :  { %890 = vmatmul.mubr.msk.f32.vlgmr.msra.gmra.mrb[0].mxu0 %vm151_vm6, %v720_v2 }
 0x103   :  { %927 = vmatpush3.bf16.msra.mxu1 %v926_v42 }
 0x106   :  { %833 = vmatmul.mubr.f32.vlgmr.msra.gmra.mrb[0].mxu1 %v229_v6 }
 0x1d5   :  { %v688_v37 = vpop.f32.mrb[0].mxu0 }
 0x1d6   :  { %v891_v39 = vpop.f32.mrb[1].mxu0 }
 0x1d9   :  { %v433_v40 = vpop.f32.mrb[0].mxu1 }
 0x1da   :  { %v964_v47 = vadd.f32 %v688_v37, %v433_v40  ;;  %v834_v49 = vpop.f32.mrb[1].mxu1 }
 0x1dc   :  { %692 = vst [vmem:[#allocation9] sm:$0xff] %v964_v47 }
 0x1dd   :  { %1071 = shalt.err (!%p1068_p9)
}
 0x1de   :  { %s1072_s7 = scalar_lea.hbm %s1343_s3, 128 }
 0x1df   :  { %p1073_p10 = scmp.ne.s32.totalorder %s1343_s3, %s1072_s7  ;;  %p1076_p11 = scmp.lt.u32.totalorder %s1072_s7, %s1343_s3 }
 0x1e1   :  { %p1078_p12 = pnand %p1076_p11, %p1073_p10 }
 0x1e3   :  { %1081 = shalt.err (!%p1078_p12)
}
 0x1e4   :  { %702 = dma.vmem_to_hbm [thread:$0]  %s700_s0, 128, %s1343_s3, [#allocation6]  }
 0x1e5   :  { %1088 = dma.done.wait [#allocation6], 128  }
 0x1e6   :  { %1089 = vsyncadd [#allocation6], 4294967168 }
 0x1e7   :  { %706 = vsyncpa [#allocation5], 1 }
 0x1e8   :  { %707 = vsyncpa [#allocation8], 1 }
 0x1e9   :  { %708 = vsyncpa [#allocation6], 1 }

</bundles_post_ra>
